<compile_context>
chip_gen: v5e
topology: v5e:2x2
jax: 0.10.0
libtpu: 0.0.40
codegen_flags: <defaults>
</compile_context>

<pallas_src>
import jax
import jax.numpy as jnp
from jax.experimental import pallas as pl
from jax.experimental.pallas import tpu as pltpu


def _dnn_kernel(z_ref, w1_ref, b1_ref, w2_ref, b2_ref, o_ref):
    # Cast the streamed operands to bf16 right before the MXU dot (in-kernel
    # cast: no extra HBM traffic).  Accumulate in f32.
    z = z_ref[...].astype(jnp.bfloat16)
    w1 = w1_ref[...].astype(jnp.bfloat16)
    h = jnp.dot(z, w1, preferred_element_type=jnp.float32)      # (TB, E) f32, MXU
    h = jnp.maximum(h + b1_ref[...], 0.0)                       # bias + ReLU, VPU, f32
    # Layer 2 (out_features == 1): VPU multiply + XLU lane reduction, f32.
    o = jnp.sum(h * w2_ref[...], axis=-1) + b2_ref[0]           # (TB,) f32
    # Lane-dense store: one (1, TB) row per batch tile.
    o_ref[...] = o.reshape(1, -1).astype(o_ref.dtype)
    # TODO(synk): for E=32 a block-diagonal 128x128 W1 (4 rows packed per vreg)
    # would restore full lane density; skipped since the op is HBM-bound.


def _round_up(x, m):
    return pl.cdiv(x, m) * m


def dnn_forward(z, w1, b1, w2, b2, *, block_b=8192):
    """Forward pass of DNN: relu(z @ W1 + b1) @ W2 + b2.

    z: (B, E); w1: (E, E); b1: (E,); w2: (E, 1); b2: (1,).
    Weights are stored (in_features, out_features); PyTorch Linear stores
    (out, in), so transpose before calling. Returns (B, 1) float32.
    """
    B, E = z.shape
    LANE, SUB = 128, 8

    # Batch tile: a multiple of 128 (keeps the (1, tb) output block lane-dense),
    # as large as possible to amortize per-grid-step overhead, but no larger
    # than ceil(B/2) rounded up to 128 so that for large B the grid stays >= 2
    # and v7x's two TensorCores are both fed ("parallel" batch axis).
    block_b = int(_round_up(max(int(block_b), LANE), LANE))
    half_b = int(_round_up(pl.cdiv(B, 2), LANE))
    tb = min(block_b, half_b)

    # Keep double-buffered z tiles comfortably inside VMEM.  In VMEM the lane
    # dim is padded to 128; be conservative and assume 4 bytes/element.
    e_lanes = int(_round_up(E, LANE))
    max_tb = max(LANE, (((40 << 20) // (2 * e_lanes * 4)) // LANE) * LANE)
    tb = max(LANE, min(tb, max_tb))

    grid = int(pl.cdiv(B, tb))          # ragged tail handled by boundary blocks
    n_pad = grid * tb                   # padded output columns are sliced off

    # Explicit VMEM budget (lane/sublane padding included), capped at 48 MiB so
    # there is headroom under v7x's 64 MiB physical VMEM; also raises v5e's
    # 16 MiB scoped default.
    z_bytes = 2 * tb * e_lanes * 4                             # double-buffered z
    out_bytes = 2 * SUB * tb * 4                               # (1, tb) -> (8, tb) padded
    w_bytes = 2 * 3 * int(_round_up(E, SUB)) * e_lanes * 4     # W1 + b1 + w2 row
    vmem_limit = int(min(48 << 20, z_bytes + out_bytes + w_bytes + (8 << 20)))
    # TODO(synk): for very large E (W1 tens of MiB) tile W1 over K/N with extra
    # grid axes instead of keeping it fully VMEM-resident.

    # Tiny weight/bias arrays; casting these does not add meaningful HBM traffic.
    w1_c = w1.astype(jnp.float32)
    b1_2d = b1.reshape(1, E).astype(jnp.float32)
    w2_row = w2.reshape(1, E).astype(jnp.float32)   # (E, 1) -> (1, E) for VPU mul
    b2_1d = b2.reshape(1).astype(jnp.float32)

    out = pl.pallas_call(
        _dnn_kernel,
        out_shape=jax.ShapeDtypeStruct((1, n_pad), jnp.float32),
        grid=(grid,),
        in_specs=[
            pl.BlockSpec((tb, E), lambda i: (i, 0)),              # z: streamed, producer dtype
            pl.BlockSpec((E, E), lambda i: (0, 0)),               # W1: VMEM-resident
            pl.BlockSpec((1, E), lambda i: (0, 0)),               # b1: resident
            pl.BlockSpec((1, E), lambda i: (0, 0)),               # w2 row: resident
            pl.BlockSpec(memory_space=pltpu.MemorySpace.SMEM),    # b2: scalar
        ],
        out_specs=pl.BlockSpec((1, tb), lambda i: (0, i)),        # lane-dense out
        compiler_params=pltpu.CompilerParams(
            dimension_semantics=("parallel",),
            vmem_limit_bytes=vmem_limit,
        ),
    )(z, w1_c, b1_2d, w2_row, b2_1d)

    return out[0, :B].reshape(B, 1)


def init_params(key, embedding_size):
    """Deterministic init mimicking PyTorch's default Linear init (uniform +/- 1/sqrt(fan_in))."""
    k1, k2, k3, k4 = jax.random.split(key, 4)
    bound1 = 1.0 / (embedding_size ** 0.5)
    # PyTorch stores weight as (out, in); we keep (in, out) for row-major matmul.
    w1 = jax.random.uniform(k1, (embedding_size, embedding_size),
                            minval=-bound1, maxval=bound1, dtype=jnp.float32)
    b1 = jax.random.uniform(k2, (embedding_size,),
                            minval=-bound1, maxval=bound1, dtype=jnp.float32)
    w2 = jax.random.uniform(k3, (embedding_size, 1),
                            minval=-bound1, maxval=bound1, dtype=jnp.float32)
    b2 = jax.random.uniform(k4, (1,),
                            minval=-bound1, maxval=bound1, dtype=jnp.float32)
    return w1, b1, w2, b2


if __name__ == "__main__":
    key = jax.random.PRNGKey(0)
    embedding_size = 32
    batch = 8

    kz, kp = jax.random.split(key)
    z = jax.random.normal(kz, (batch, embedding_size), dtype=jnp.float32)
    w1, b1, w2, b2 = init_params(kp, embedding_size)

    out = dnn_forward(z, w1, b1, w2, b2)
    jax.block_until_ready(out)

    # Pure-JAX reference using the same bf16-rounded z/W1 the kernel feeds the
    # MXU (accumulation is f32 in both), so a tight tolerance is meaningful.
    zc = z.astype(jnp.bfloat16).astype(jnp.float32)
    w1c = w1.astype(jnp.bfloat16).astype(jnp.float32)
    h = jnp.maximum(jnp.dot(zc, w1c, precision=jax.lax.Precision.HIGHEST) + b1, 0.0)
    ref = jnp.dot(h, w2, precision=jax.lax.Precision.HIGHEST) + b2
    assert out.shape == (batch, 1)
    assert jnp.allclose(out, ref, atol=2e-3, rtol=2e-3), "mismatch vs reference"

    print("KERNEL_OK")
</pallas_src>

<mosaic_0001>
module attributes {stable_mosaic.version = 11 : i64} {
  func.func @_dnn_kernel(%arg0: i32, %arg1: memref<128x32xf32, #tpu.memory_space<vmem>>, %arg2: memref<32x32xf32, #tpu.memory_space<vmem>>, %arg3: memref<1x32xf32, #tpu.memory_space<vmem>>, %arg4: memref<1x32xf32, #tpu.memory_space<vmem>>, %arg5: memref<1xf32, #tpu.memory_space<smem>>, %arg6: memref<1x128xf32, #tpu.memory_space<vmem>>) attributes {dimension_semantics = [#tpu.dimension_semantics<parallel>], iteration_bounds = array<i64: 1>, scalar_prefetch = 0 : i64, scratch_operands = 0 : i64, tpu.core_type = #tpu.core_type<tc>, window_params = [{transform_indices = @transform_0, window_bounds = array<i64: 128, 32>}, {pipeline_mode = #tpu.pipeline_mode<synchronous>, transform_indices = @transform_1, window_bounds = array<i64: 32, 32>}, {pipeline_mode = #tpu.pipeline_mode<synchronous>, transform_indices = @transform_2, window_bounds = array<i64: 1, 32>}, {pipeline_mode = #tpu.pipeline_mode<synchronous>, transform_indices = @transform_3, window_bounds = array<i64: 1, 32>}, {transform_indices = @transform_4, window_bounds = array<i64: 1>}, {transform_indices = @transform_5, window_bounds = array<i64: 1, 128>}]} {
    %c0 = arith.constant 0 : index
    %c0_0 = arith.constant 0 : index
    %0 = vector.load %arg1[%c0, %c0_0] : memref<128x32xf32, #tpu.memory_space<vmem>>, vector<128x32xf32>
    %1 = arith.truncf %0 : vector<128x32xf32> to vector<128x32xbf16>
    %c0_1 = arith.constant 0 : index
    %c0_2 = arith.constant 0 : index
    %2 = vector.load %arg2[%c0_1, %c0_2] : memref<32x32xf32, #tpu.memory_space<vmem>>, vector<32x32xf32>
    %3 = arith.truncf %2 : vector<32x32xf32> to vector<32x32xbf16>
    %cst = arith.constant dense<0.000000e+00> : vector<128x32xf32>
    %4 = tpu.matmul %1, %3, %cst {dimension_numbers = #tpu.dot_dimension_numbers<[1], [0], [0], [1], [0, 0, 1, 1], [], []>} : vector<128x32xbf16>, vector<32x32xbf16>, vector<128x32xf32> -> vector<128x32xf32>
    %c0_3 = arith.constant 0 : index
    %c0_4 = arith.constant 0 : index
    %5 = vector.load %arg3[%c0_3, %c0_4] : memref<1x32xf32, #tpu.memory_space<vmem>>, vector<1x32xf32>
    %6 = vector.broadcast %5 : vector<1x32xf32> to vector<128x32xf32>
    %7 = arith.addf %4, %6 : vector<128x32xf32>
    %cst_5 = arith.constant 0.000000e+00 : f32
    %8 = vector.broadcast %cst_5 : f32 to vector<128x32xf32>
    %9 = arith.maximumf %7, %8 : vector<128x32xf32>
    %c0_6 = arith.constant 0 : index
    %c0_7 = arith.constant 0 : index
    %10 = vector.load %arg4[%c0_6, %c0_7] : memref<1x32xf32, #tpu.memory_space<vmem>>, vector<1x32xf32>
    %11 = vector.broadcast %10 : vector<1x32xf32> to vector<128x32xf32>
    %12 = arith.mulf %9, %11 : vector<128x32xf32>
    %cst_8 = arith.constant dense<0.000000e+00> : vector<128xf32>
    %13 = vector.multi_reduction <add>, %12, %cst_8 [1] : vector<128x32xf32> to vector<128xf32>
    %c0_9 = arith.constant 0 : index
    %14 = memref.load %arg5[%c0_9] : memref<1xf32, #tpu.memory_space<smem>>
    %15 = vector.broadcast %14 : f32 to vector<128xf32>
    %16 = arith.addf %13, %15 : vector<128xf32>
    %17 = vector.shape_cast %16 : vector<128xf32> to vector<1x128xf32>
    %c0_10 = arith.constant 0 : index
    %c0_11 = arith.constant 0 : index
    %18 = vector.load %arg6[%c0_10, %c0_11] : memref<1x128xf32, #tpu.memory_space<vmem>>, vector<1x128xf32>
    tpu.vector_store %arg6[%c0_10, %c0_11], %17 {strides = array<i32>} : memref<1x128xf32, #tpu.memory_space<vmem>>, vector<1x128xf32>,
    return
  }
  func.func @transform_0(%arg0: i32) -> (i32, i32) {
    %c0_i32 = arith.constant 0 : i32
    %c0_i32_0 = arith.constant 0 : i32
    return %arg0, %c0_i32 : i32, i32
  }
  func.func @transform_1(%arg0: i32) -> (i32, i32) {
    %c0_i32 = arith.constant 0 : i32
    %c0_i32_0 = arith.constant 0 : i32
    %c0_i32_1 = arith.constant 0 : i32
    return %c0_i32, %c0_i32_0 : i32, i32
  }
  func.func @transform_2(%arg0: i32) -> (i32, i32) {
    %c0_i32 = arith.constant 0 : i32
    %c0_i32_0 = arith.constant 0 : i32
    %c0_i32_1 = arith.constant 0 : i32
    return %c0_i32, %c0_i32_0 : i32, i32
  }
  func.func @transform_3(%arg0: i32) -> (i32, i32) {
    %c0_i32 = arith.constant 0 : i32
    %c0_i32_0 = arith.constant 0 : i32
    %c0_i32_1 = arith.constant 0 : i32
    return %c0_i32, %c0_i32_0 : i32, i32
  }
  func.func @transform_4(%arg0: i32) -> i32 {
    %c0_i32 = arith.constant 0 : i32
    %c0_i32_0 = arith.constant 0 : i32
    return %c0_i32 : i32
  }
  func.func @transform_5(%arg0: i32) -> (i32, i32) {
    %c0_i32 = arith.constant 0 : i32
    %c0_i32_0 = arith.constant 0 : i32
    return %c0_i32, %arg0 : i32, i32
  }
}

</mosaic_0001>

<bundles_post_ra>
// kernel: tpu_custom_call.1
= control target key start
LH: loop header
LB: loop body
LE: loop exit
PB: predicated region body
PF: predicated region fallthrough
CT: control target
= control target key end

     0   :  { %11 = vsyncpa [#allocation4], 0  ;;  %s612_s0 = inlined_call_operand.hbm [shape: f32[8,32], index: 0, kind: input, shape index: {}]   ;;  %s613_s1 = inlined_call_operand.hbm [shape: f32[32,32], index: 1, kind: input, shape index: {}]   ;;  %s614_s2 = inlined_call_operand.vmem [shape: f32[1,32], index: 2, kind: input, shape index: {}]   ;;  %s615_s3 = inlined_call_operand.vmem [shape: f32[1,32], index: 3, kind: input, shape index: {}]   ;;  %s616_s4 = inlined_call_operand.<no memory space> [shape: f32[1], index: 4, kind: input, shape index: {}]   ;;  %s617_s5 = inlined_call_operand.hbm [shape: f32[1,128], index: 5, kind: output, shape index: {}]  }
   0x1   :  { %12 = vsyncpa [#allocation7], 0 }
   0x2   :  { %13 = vsyncpa [#allocation5], 0 }
   0x3   :  { %17 = vsyncadd [#allocation4], 1920  ;;  %s18_s20 = sshll.u32 %s612_s0, 4  ;;  %s463_s21 = smov [#allocation3]   ;;  %s19_s20 = int_to_ptr.hbm [resolvable:$true] %s18_s20 }
   0x4   :  { %s20_s22 = sshll.u32 %s463_s21, 4  ;;  %s31_s25 = sshll.u32 %s613_s1, 4  ;;  %s21_s22 = int_to_ptr.vmem [resolvable:$true] %s20_s22  ;;  %s32_s25 = int_to_ptr.hbm [resolvable:$true] %s31_s25 }
   0x5   :  { %s464_s26 = smov 128   ;;  %s465_s27 = smov 8  }
   0x6   :  { %26 = dma.hbm_to_vmem [thread:$0]  %s19_s20, 128, %s21_s22, [#allocation4], %s464_s26, %s464_s26, %s465_s27  }
   0x7   :  { %s466_s28 = smov [#allocation6]  }
   0x8   :  { %s33_s29 = sshll.u32 %s466_s28, 4  ;;  %s34_s29 = int_to_ptr.vmem [resolvable:$true] %s33_s29 }
   0x9   :  { %39 = dma.hbm_to_vmem [thread:$0]  %s32_s25, 512, %s34_s29, [#allocation7], %s464_s26, %s464_s26, %s465_s27  }
   0xa   :  { %457 = dma.done.wait [#allocation4], 2048  }
   0xb   :  { %458 = vsyncadd [#allocation4], 4294965248 }
   0xc   :  { %459 = dma.done.wait [#allocation7], 512  }
   0xd   :  { %460 = vsyncadd [#allocation7], 4294966784  ;;  %v81_v0 = vld [vmem:[#allocation6 + $0x10] sm:$0xff]  ;;  %v82_v1 = vld [vmem:[#allocation6 + $0x18] sm:$0xff]  ;;  %vm89_vm0 = vcmask 261120   ;;  %vm286_vm1 = vcmask 130112  }
   0xe   :  { %v79_v2 = vld [vmem:[#allocation6] sm:$0xff]  ;;  %v84_v3 = vpack.c.bf16 %v82_v1, %v81_v0  ;;  %v80_v4 = vld [vmem:[#allocation6 + $0x8] sm:$0xff]  ;;  %v57_v18 = vld [vmem:[#allocation3 + $0x10] sm:$0xff]  ;;  %vm290_vm2 = vcmask 195712   ;;  %vm294_vm3 = vcmask 261312   ;;  %vm298_vm4 = vcmask 326912  }
   0xf   :  { %v55_v5 = vld [vmem:[#allocation3] sm:$0xff]  ;;  %v56_v6 = vld [vmem:[#allocation3 + $0x8] sm:$0xff]  ;;  %v83_v7 = vpack.c.bf16 %v80_v4, %v79_v2  ;;  %v58_v19 = vld [vmem:[#allocation3 + $0x18] sm:$0xff]  ;;  %vm302_vm5 = vcmask 392512   ;;  %vm306_vm6 = vcmask 458112   ;;  %vm310_vm7 = vcmask 523712  }
  0x10   :  { %120 = vmatpush.bf16.msra.mxu0 %v84_v3  ;;  %372 = vmatpush.bf16.msra.mxu1 %v84_v3  ;;  %v59_v8 = vld [vmem:[#allocation3 + $0x20] sm:$0xff]  ;;  %v60_v9 = vld [vmem:[#allocation3 + $0x28] sm:$0xff]  ;;  %v71_v14 = vpack.c.bf16 %v56_v6, %v55_v5  ;;  %v65_v20 = vld [vmem:[#allocation3 + $0x50] sm:$0xff]  ;;  %v72_v26 = vpack.c.bf16 %v58_v19, %v57_v18  ;;  %vm314_vm8 = vcmask 589312   ;;  %vm318_vm9 = vcmask 654912   ;;  %s353_s10 = sshll.u32 %s617_s5, 4  ;;  %s354_s10 = int_to_ptr.hbm [resolvable:$true] %s353_s10 }
  0x11   :  { %v63_v10 = vld [vmem:[#allocation3 + $0x40] sm:$0xff]  ;;  %373 = vmatpush.bf16.msra.mxu2 %v84_v3  ;;  %v64_v11 = vld [vmem:[#allocation3 + $0x48] sm:$0xff]  ;;  %374 = vmatpush.bf16.msra.mxu3 %v84_v3  ;;  %v73_v15 = vpack.c.bf16 %v60_v9, %v59_v8  ;;  %v61_v21 = vld [vmem:[#allocation3 + $0x30] sm:$0xff]  ;;  %vm322_vm10 = vcmask 720512   ;;  %vm326_vm11 = vcmask 786112   ;;  %vm330_vm12 = vcmask 851712  }
  0x12   :  { %v67_v12 = vld [vmem:[#allocation3 + $0x60] sm:$0xff]  ;;  %v68_v13 = vld [vmem:[#allocation3 + $0x68] sm:$0xff]  ;;  %v75_v16 = vpack.c.bf16 %v64_v11, %v63_v10  ;;  %v62_v22 = vld [vmem:[#allocation3 + $0x38] sm:$0xff]  ;;  %vm334_vm13 = vcmask 917312   ;;  %vm338_vm14 = vcmask 982912   ;;  %vm342_vm15 = vcmask 1048512  }
  0x13   :  { %v77_v17 = vpack.c.bf16 %v68_v13, %v67_v12  ;;  %v66_v23 = vld [vmem:[#allocation3 + $0x58] sm:$0xff]  ;;  %v69_v24 = vld [vmem:[#allocation3 + $0x70] sm:$0xff]  ;;  %v74_v27 = vpack.c.bf16 %v62_v22, %v61_v21  ;;  %v515_v30 = vld [vmem:[%s614_s2] ss:$0 sm:$0xff] }
  0x14   :  { %121 = vmatpush.bf16.msra.mxu0 %v83_v7  ;;  %375 = vmatpush.bf16.msra.mxu1 %v83_v7  ;;  %v70_v25 = vld [vmem:[#allocation3 + $0x78] sm:$0xff]  ;;  %v76_v28 = vpack.c.bf16 %v66_v23, %v65_v20  ;;  %v522_v35 = vld [vmem:[%s615_s3] ss:$0 sm:$0xff] }
  0x15   :  { %376 = vmatpush.bf16.msra.mxu2 %v83_v7  ;;  %377 = vmatpush.bf16.msra.mxu3 %v83_v7  ;;  %v78_v29 = vpack.c.bf16 %v70_v25, %v69_v24 }
  0x17   :  { %364 = vmatmul.msk.bf16.vlgmr.msra.gmra.mxu0 %vm89_vm0, %v71_v14  ;;  %366 = vmatmul.msk.bf16.vlgmr.msra.gmra.mxu1 %vm89_vm0, %v73_v15 }
  0x18   :  { %368 = vmatmul.msk.bf16.vlgmr.msra.gmra.mxu2 %vm89_vm0, %v75_v16  ;;  %370 = vmatmul.msk.bf16.vlgmr.msra.gmra.mxu3 %vm89_vm0, %v77_v17 }
  0x27   :  { %365 = vmatmul.msk.bf16.gmra.mxu0 %vm89_vm0, %v72_v26  ;;  %367 = vmatmul.msk.bf16.gmra.mxu1 %vm89_vm0, %v74_v27 }
  0x28   :  { %369 = vmatmul.msk.bf16.gmra.mxu2 %vm89_vm0, %v76_v28  ;;  %371 = vmatmul.msk.bf16.gmra.mxu3 %vm89_vm0, %v78_v29 }
  0x94   :  { %v123_v31 = vpop.f32.mrf.mxu0  ;;  %v133_v32 = vpop.f32.mrf.mxu1 }
  0x95   :  { %v124_v33 = vadd.f32 %v515_v30, %v123_v31  ;;  %v134_v34 = vadd.f32 %v515_v30, %v133_v32 }
  0x97   :  { %v163_v36 = vmax.f32 %v124_v33, 0.0  ;;  %v167_v37 = vmax.f32 %v134_v34, 0.0 }
  0x99   :  { %v187_v38 = vmul.f32 %v522_v35, %v167_v37  ;;  %v183_v39 = vmul.f32 %v522_v35, %v163_v36 }
  0x9b   :  { %v143_v40 = vpop.f32.mrf.mxu2  ;;  %v211_v41 = vsel %vm89_vm0, %v187_v38, 0.0  ;;  %v199_v42 = vsel %vm89_vm0, %v183_v39, 0.0  ;;  %v153_v43 = vpop.f32.mrf.mxu3 }
  0x9c   :  { %v144_v44 = vadd.f32 %v515_v30, %v143_v40  ;;  %212 = vadd.xlane.f32.xlu2 %v211_v41  ;;  %v125_v45 = vpop.f32.mrf.mxu0  ;;  %200 = vadd.xlane.f32.xlu0 %v199_v42  ;;  %v135_v46 = vpop.f32.mrf.mxu1  ;;  %v154_v15 = vadd.f32 %v515_v30, %v153_v43 }
  0x9d   :  { %v126_v47 = vadd.f32 %v515_v30, %v125_v45  ;;  %v136_v48 = vadd.f32 %v515_v30, %v135_v46 }
  0x9e   :  { %v171_v49 = vmax.f32 %v144_v44, 0.0  ;;  %v175_v22 = vmax.f32 %v154_v15, 0.0 }
  0x9f   :  { %v164_v50 = vmax.f32 %v126_v47, 0.0  ;;  %v168_v52 = vmax.f32 %v136_v48, 0.0 }
  0xa0   :  { %v191_v51 = vmul.f32 %v522_v35, %v171_v49  ;;  %v195_v33 = vmul.f32 %v522_v35, %v175_v22 }
  0xa1   :  { %v184_v53 = vmul.f32 %v522_v35, %v164_v50  ;;  %v188_v62 = vmul.f32 %v522_v35, %v168_v52 }
  0xa2   :  { %v223_v54 = vsel %vm89_vm0, %v191_v51, 0.0  ;;  %v235_v39 = vsel %vm89_vm0, %v195_v33, 0.0 }
  0xa3   :  { %v145_v55 = vpop.f32.mrf.mxu2  ;;  %v202_v56 = vsel %vm89_vm0, %v184_v53, 0.0  ;;  %v155_v57 = vpop.f32.mrf.mxu3  ;;  %v214_v3 = vsel %vm89_vm0, %v188_v62, 0.0 }
  0xa4   :  { %v146_v58 = vadd.f32 %v515_v30, %v145_v55  ;;  %224 = vadd.xlane.f32.xlu2 %v223_v54  ;;  %v128_v59 = vpop.f32.mrf.mxu0  ;;  %203 = vadd.xlane.f32.xlu0 %v202_v56  ;;  %v138_v60 = vpop.f32.mrf.mxu1  ;;  %v156_v42 = vadd.f32 %v515_v30, %v155_v57  ;;  %v281_v55 = vlaneseq }
  0xa5   :  { %v129_v61 = vadd.f32 %v515_v30, %v128_v59  ;;  %v139_v0 = vadd.f32 %v515_v30, %v138_v60 }
  0xa6   :  { %v172_v63 = vmax.f32 %v146_v58, 0.0  ;;  %v176_v46 = vmax.f32 %v156_v42, 0.0  ;;  %v570_v57 = vand.u32 127, %v281_v55  ;;  %v575_v58 = vstv %s616_s4  ;;  %s467_s4 = smov [#allocation8]  }
  0xa7   :  { %v165_v1 = vmax.f32 %v129_v61, 0.0  ;;  %v169_v5 = vmax.f32 %v139_v0, 0.0  ;;  %s351_s7 = sshll.u32 %s467_s4, 4  ;;  %s352_s7 = int_to_ptr.vmem [resolvable:$true] %s351_s7 }
  0xa8   :  { %v192_v2 = vmul.f32 %v522_v35, %v172_v63  ;;  %v196_v48 = vmul.f32 %v522_v35, %v176_v46  ;;  %v288_v60 = vadd.s32 4294967280, %v570_v57  ;;  %v308_v22 = vadd.s32 4294967240, %v570_v57 }
  0xa9   :  { %v185_v4 = vmul.f32 %v522_v35, %v165_v1  ;;  %v189_v13 = vmul.f32 %v522_v35, %v169_v5 }
  0xaa   :  { %v226_v11 = vsel %vm89_vm0, %v192_v2, 0.0  ;;  %v238_v49 = vsel %vm89_vm0, %v196_v48, 0.0  ;;  %v292_v2 = vadd.s32 4294967272, %v570_v57 }
  0xab   :  { %v148_v6 = vpop.f32.mrf.mxu2  ;;  %v205_v7 = vsel %vm89_vm0, %v185_v4, 0.0  ;;  %v158_v8 = vpop.f32.mrf.mxu3  ;;  %v217_v18 = vsel %vm89_vm0, %v189_v13, 0.0 }
  0xac   :  { %v149_v9 = vadd.f32 %v515_v30, %v148_v6  ;;  %215 = vadd.xlane.f32.xlu2 %v214_v3  ;;  %v130_v10 = vpop.f32.mrf.mxu0  ;;  %206 = vadd.xlane.f32.xlu1 %v205_v7  ;;  %v140_v24 = vpop.f32.mrf.mxu1  ;;  %v159_v25 = vadd.f32 %v515_v30, %v158_v8  ;;  %v296_v3 = vadd.s32 4294967264, %v570_v57 }
  0xad   :  { %227 = vadd.xlane.f32.xlu0 %v226_v11  ;;  %v131_v14 = vadd.f32 %v515_v30, %v130_v10  ;;  %v141_v28 = vadd.f32 %v515_v30, %v140_v24 }
  0xae   :  { %v173_v12 = vmax.f32 %v149_v9, 0.0  ;;  %v177_v31 = vmax.f32 %v159_v25, 0.0  ;;  %v300_v9 = vadd.s32 4294967256, %v570_v57  ;;  %v316_v25 = vadd.s32 4294967224, %v570_v57 }
  0xaf   :  { %v166_v19 = vmax.f32 %v131_v14, 0.0  ;;  %v170_v37 = vmax.f32 %v141_v28, 0.0 }
  0xb0   :  { %v193_v16 = vmul.f32 %v522_v35, %v173_v12  ;;  %v197_v40 = vmul.f32 %v522_v35, %v177_v31  ;;  %v320_v31 = vadd.s32 4294967216, %v570_v57 }
  0xb1   :  { %v186_v29 = vmul.f32 %v522_v35, %v166_v19  ;;  %v190_v43 = vmul.f32 %v522_v35, %v170_v37 }
  0xb2   :  { %v229_v17 = vsel %vm89_vm0, %v193_v16, 0.0  ;;  %v241_v44 = vsel %vm89_vm0, %v197_v40, 0.0 }
  0xb3   :  { %v150_v20 = vpop.f32.mrf.mxu2  ;;  %v160_v21 = vpop.f32.mrf.mxu3  ;;  %v208_v38 = vsel %vm89_vm0, %v186_v29, 0.0  ;;  %v220_v47 = vsel %vm89_vm0, %v190_v43, 0.0 }
  0xb4   :  { %v151_v23 = vadd.f32 %v515_v30, %v150_v20  ;;  %230 = vadd.xlane.f32.xlu1 %v229_v17  ;;  %v161_v27 = vadd.f32 %v515_v30, %v160_v21  ;;  %v304_v17 = vadd.s32 4294967248, %v570_v57 }
  0xb5   :  { %218 = vadd.xlane.f32.xlu0 %v217_v18 }
  0xb6   :  { %v174_v26 = vmax.f32 %v151_v23, 0.0  ;;  %v178_v36 = vmax.f32 %v161_v27, 0.0  ;;  %v312_v23 = vadd.s32 4294967232, %v570_v57 }
  0xb8   :  { %v194_v32 = vmul.f32 %v522_v35, %v174_v26  ;;  %v198_v41 = vmul.f32 %v522_v35, %v178_v36  ;;  %v284_v35 = vadd.s32 4294967288, %v570_v57 }
  0xba   :  { %v232_v34 = vsel %vm89_vm0, %v194_v32, 0.0  ;;  %v244_v45 = vsel %vm89_vm0, %v198_v41, 0.0  ;;  %v328_v41 = vadd.s32 4294967200, %v570_v57 }
  0xbb   :  { %233 = vadd.xlane.f32.xlu2 %v232_v34  ;;  %v324_v34 = vadd.s32 4294967208, %v570_v57 }
  0xbc   :  { %209 = vadd.xlane.f32.xlu1 %v208_v38 }
  0xbd   :  { %236 = vadd.xlane.f32.xlu0 %v235_v39 }
  0xc3   :  { %242 = vadd.xlane.f32.xlu2 %v241_v44 }
  0xc4   :  { %221 = vadd.xlane.f32.xlu1 %v220_v47 }
  0xc5   :  { %245 = vadd.xlane.f32.xlu0 %v244_v45 }
  0xcc   :  { %239 = vadd.xlane.f32.xlu1 %v238_v49 }
 0x10f   :  { %v201_v50 = vpop.xlane.xlu0 %200  ;;  %v213_v30 = vpop.xlane.xlu2 %212 }
 0x110   :  { %v249_v63 = vadd.f32 %v575_v58, %v201_v50  ;;  %v253_v4 = vadd.f32 %v575_v58, %v213_v30  ;;  %v332_v50 = vadd.s32 4294967192, %v570_v57 }
 0x112   :  { %v283_v7 = vperm.slane %v249_v63, %v570_v57  ;;  %v297_v13 = vperm.slane %v253_v4, %v296_v3 }
 0x117   :  { %v204_v51 = vpop.xlane.xlu0 %203  ;;  %v225_v54 = vpop.xlane.xlu2 %224 }
 0x118   :  { %v250_v59 = vadd.f32 %v575_v58, %v204_v51  ;;  %v257_v24 = vadd.f32 %v575_v58, %v225_v54  ;;  %v336_v51 = vadd.s32 4294967184, %v570_v57 }
 0x11a   :  { %v285_v1 = vperm.slane %v250_v59, %v284_v35  ;;  %v313_v38 = vperm.slane %v257_v24, %v312_v23 }
 0x11c   :  { %v287_v10 = vsel %vm286_vm1, %v285_v1, %v283_v7 }
 0x11f   :  { %v207_v52 = vpop.xlane.xlu1 %206  ;;  %v216_v0 = vpop.xlane.xlu2 %215 }
 0x120   :  { %v228_v53 = vpop.xlane.xlu0 %227  ;;  %v251_v61 = vadd.f32 %v575_v58, %v207_v52  ;;  %v254_v11 = vadd.f32 %v575_v58, %v216_v0  ;;  %v340_v52 = vadd.s32 4294967176, %v570_v57 }
 0x121   :  { %v258_v27 = vadd.f32 %v575_v58, %v228_v53 }
 0x122   :  { %v289_v5 = vperm.slane %v251_v61, %v288_v60  ;;  %v301_v21 = vperm.slane %v254_v11, %v300_v9 }
 0x123   :  { %v317_v40 = vperm.slane %v258_v27, %v316_v25 }
 0x124   :  { %v291_v14 = vsel %vm290_vm2, %v289_v5, %v287_v10 }
 0x127   :  { %v231_v56 = vpop.xlane.xlu1 %230 }
 0x128   :  { %v219_v62 = vpop.xlane.xlu0 %218  ;;  %v259_v32 = vadd.f32 %v575_v58, %v231_v56 }
 0x129   :  { %v255_v18 = vadd.f32 %v575_v58, %v219_v62 }
 0x12a   :  { %v321_v44 = vperm.slane %v259_v32, %v320_v31 }
 0x12b   :  { %v305_v33 = vperm.slane %v255_v18, %v304_v17 }
 0x12e   :  { %v234_v15 = vpop.xlane.xlu2 %233 }
 0x12f   :  { %v210_v6 = vpop.xlane.xlu1 %209  ;;  %v260_v36 = vadd.f32 %v575_v58, %v234_v15 }
 0x130   :  { %v252_v8 = vadd.f32 %v575_v58, %v210_v6  ;;  %v237_v20 = vpop.xlane.xlu0 %236 }
 0x131   :  { %v261_v45 = vadd.f32 %v575_v58, %v237_v20  ;;  %v325_v48 = vperm.slane %v260_v36, %v324_v34 }
 0x132   :  { %v293_v12 = vperm.slane %v252_v8, %v292_v2 }
 0x133   :  { %v329_v59 = vperm.slane %v261_v45, %v328_v41 }
 0x134   :  { %v295_v16 = vsel %vm294_vm3, %v293_v12, %v291_v14 }
 0x135   :  { %v299_v19 = vsel %vm298_vm4, %v297_v13, %v295_v16 }
 0x136   :  { %v303_v29 = vsel %vm302_vm5, %v301_v21, %v299_v19  ;;  %v243_v43 = vpop.xlane.xlu2 %242 }
 0x137   :  { %v222_v26 = vpop.xlane.xlu1 %221  ;;  %v307_v39 = vsel %vm306_vm6, %v305_v33, %v303_v29  ;;  %v263_v30 = vadd.f32 %v575_v58, %v243_v43 }
 0x138   :  { %v256_v28 = vadd.f32 %v575_v58, %v222_v26  ;;  %v246_v47 = vpop.xlane.xlu0 %245 }
 0x139   :  { %v264_v55 = vadd.f32 %v575_v58, %v246_v47  ;;  %v337_v61 = vperm.slane %v263_v30, %v336_v51 }
 0x13a   :  { %v309_v37 = vperm.slane %v256_v28, %v308_v22 }
 0x13b   :  { %v341_v62 = vperm.slane %v264_v55, %v340_v52 }
 0x13c   :  { %v311_v42 = vsel %vm310_vm7, %v309_v37, %v307_v39 }
 0x13d   :  { %v315_v46 = vsel %vm314_vm8, %v313_v38, %v311_v42 }
 0x13e   :  { %v319_v49 = vsel %vm318_vm9, %v317_v40, %v315_v46 }
 0x13f   :  { %v240_v53 = vpop.xlane.xlu1 %239  ;;  %v323_v54 = vsel %vm322_vm10, %v321_v44, %v319_v49 }
 0x140   :  { %v262_v56 = vadd.f32 %v575_v58, %v240_v53  ;;  %v327_v35 = vsel %vm326_vm11, %v325_v48, %v323_v54 }
 0x141   :  { %v331_v57 = vsel %vm330_vm12, %v329_v59, %v327_v35 }
 0x142   :  { %v333_v60 = vperm.slane %v262_v56, %v332_v50 }
 0x144   :  { %v335_v63 = vsel %vm334_vm13, %v333_v60, %v331_v57 }
 0x145   :  { %v339_v0 = vsel %vm338_vm14, %v337_v61, %v335_v63 }
 0x146   :  { %v343_v58 = vsel %vm342_vm15, %v341_v62, %v339_v0 }
 0x147   :  { %345 = vst [vmem:[#allocation8] sm:$0x1] %v343_v58 }
 0x148   :  { %356 = dma.vmem_to_hbm [thread:$0]  %s352_s7, 16, %s354_s10, [#allocation5]  }
 0x149   :  { %461 = dma.done.wait [#allocation5], 16  }
 0x14a   :  { %462 = vsyncadd [#allocation5], 4294967280 }
 0x14b   :  { %361 = vsyncpa [#allocation4], 1 }
 0x14c   :  { %362 = vsyncpa [#allocation7], 1 }
 0x14d   :  { %363 = vsyncpa [#allocation5], 1 }

</bundles_post_ra>
